<compile_context>
chip_gen: v5e
topology: v5e:2x2
jax: 0.10.0
libtpu: 0.0.40
codegen_flags: <defaults>
</compile_context>

<pallas_src>
import functools

import jax
import jax.numpy as jnp
from jax.experimental import pallas as pl
from jax.experimental.pallas import tpu as pltpu


def _layernorm2d_kernel(x_ref, w_ref, b_ref, o_ref, *, eps, hw):
    # x_ref: (TB, C, HW)   w_ref/b_ref: (1, C, 1)   o_ref: (TB, C, HW)
    x = x_ref[...]
    xf = x.astype(jnp.float32)

    # Per-(sample, channel) stats over the lane axis (HW).
    mean = jnp.mean(xf, axis=-1, keepdims=True)                  # (TB, C, 1)
    centered = xf - mean
    # Unbiased variance (Bessel's correction), like torch.std default.
    var = jnp.sum(centered * centered, axis=-1, keepdims=True) * (1.0 / (hw - 1))
    std = jnp.sqrt(var) + eps                                    # eps added to STD

    # Fold affine + normalization into a per-channel scale/shift so the
    # tile-wide work is a single fused multiply-add.
    inv = 1.0 / std                                              # tiny; exact divide
    scale = w_ref[...] * inv                                     # (TB, C, 1)
    shift = b_ref[...] - mean * scale                            # (TB, C, 1)

    o_ref[...] = (xf * scale + shift).astype(o_ref.dtype)


def layernorm2d(x, weight, bias, eps=1e-5):
    """x: (N, C, H, W); weight/bias: (C, 1, 1) as in the PyTorch module."""
    n, c, h, w = x.shape
    hw = h * w

    # Lane-dense layout: spatial dims flattened onto the last (lane) axis.
    x_flat = x.reshape(n, c, hw)
    w_flat = weight.reshape(1, c, 1).astype(jnp.float32)
    b_flat = bias.reshape(1, c, 1).astype(jnp.float32)

    # --- per-generation, VMEM-aware tile sizing ---------------------------
    try:
        info = pltpu.get_tpu_info()
        vmem_cap = int(getattr(info, "vmem_capacity_bytes", 64 * 1024 * 1024))
    except Exception:
        vmem_cap = 64 * 1024 * 1024
    # Allow the pipeline roughly half of physical VMEM (v7x: 32 MiB of 64).
    vmem_limit = int(min(vmem_cap // 2, 96 * 1024 * 1024))

    bytes_per_sample = c * hw * x.dtype.itemsize
    # Double-buffered input + output ~ 4x block bytes, plus f32 temporaries:
    # keep a single block to ~1/6 of the VMEM budget.
    max_block_bytes = max(vmem_limit // 6, bytes_per_sample)
    tb_cap = max(1, max_block_bytes // bytes_per_sample)
    if n >= 2:
        # Keep at least 2 grid steps so both TensorCores on v7x get work.
        tb_cap = min(tb_cap, max(1, n // 2))
    # Largest divisor of n not exceeding the cap -> exact blocks, no padding.
    tb = 1
    for d in range(1, n + 1):
        if n % d == 0 and d <= tb_cap:
            tb = d

    grid = (n // tb,)

    kernel = functools.partial(_layernorm2d_kernel, eps=eps, hw=hw)

    out_flat = pl.pallas_call(
        kernel,
        out_shape=jax.ShapeDtypeStruct((n, c, hw), x.dtype),
        grid_spec=pltpu.PrefetchScalarGridSpec(
            num_scalar_prefetch=0,
            grid=grid,
            in_specs=[
                pl.BlockSpec((tb, c, hw), lambda i: (i, 0, 0)),
                pl.BlockSpec((1, c, 1), lambda i: (0, 0, 0)),
                pl.BlockSpec((1, c, 1), lambda i: (0, 0, 0)),
            ],
            out_specs=pl.BlockSpec((tb, c, hw), lambda i: (i, 0, 0)),
        ),
        compiler_params=pltpu.CompilerParams(
            dimension_semantics=("parallel",),
            vmem_limit_bytes=vmem_limit,
        ),
    )(x_flat, w_flat, b_flat)

    return out_flat.reshape(n, c, h, w)


if __name__ == "__main__":
    key = jax.random.PRNGKey(0)
    N, C, H, W = 2, 4, 16, 16

    x = jax.random.normal(key, (N, C, H, W), dtype=jnp.float32)

    # Deterministic parameters (module init is ones/zeros; perturb slightly so
    # the affine path is actually exercised, still deterministic).
    weight = jnp.ones((C, 1, 1), dtype=jnp.float32) + 0.1 * jnp.arange(
        C, dtype=jnp.float32
    ).reshape(C, 1, 1)
    bias = 0.05 * jnp.arange(C, dtype=jnp.float32).reshape(C, 1, 1)

    out = layernorm2d(x, weight, bias, eps=1e-5)
    jax.block_until_ready(out)

    # Reference check in plain JAX (same math as the PyTorch module).
    mean = jnp.mean(x, axis=(2, 3), keepdims=True)
    var = jnp.sum((x - mean) ** 2, axis=(2, 3), keepdims=True) / (H * W - 1)
    std = jnp.sqrt(var) + 1e-5
    ref = weight.reshape(1, C, 1, 1) * (x - mean) / std + bias.reshape(1, C, 1, 1)
    assert jnp.allclose(out, ref, atol=1e-5, rtol=1e-5), "mismatch vs reference"

    print("KERNEL_OK")
</pallas_src>

<mosaic_0001>
module attributes {stable_mosaic.version = 11 : i64} {
  func.func @_layernorm2d_kernel(%arg0: i32, %arg1: memref<1x4x256xf32, #tpu.memory_space<vmem>>, %arg2: memref<1x4x1xf32, #tpu.memory_space<vmem>>, %arg3: memref<1x4x1xf32, #tpu.memory_space<vmem>>, %arg4: memref<1x4x256xf32, #tpu.memory_space<vmem>>) attributes {dimension_semantics = [#tpu.dimension_semantics<parallel>], iteration_bounds = array<i64: 2>, scalar_prefetch = 0 : i64, scratch_operands = 0 : i64, tpu.core_type = #tpu.core_type<tc>, window_params = [{transform_indices = @transform_0, window_bounds = array<i64: 1, 4, 256>}, {pipeline_mode = #tpu.pipeline_mode<synchronous>, transform_indices = @transform_1, window_bounds = array<i64: 1, 4, 1>}, {pipeline_mode = #tpu.pipeline_mode<synchronous>, transform_indices = @transform_2, window_bounds = array<i64: 1, 4, 1>}, {transform_indices = @transform_3, window_bounds = array<i64: 1, 4, 256>}]} {
    %c0 = arith.constant 0 : index
    %c0_0 = arith.constant 0 : index
    %c0_1 = arith.constant 0 : index
    %0 = vector.load %arg1[%c0, %c0_0, %c0_1] : memref<1x4x256xf32, #tpu.memory_space<vmem>>, vector<1x4x256xf32>
    %cst = arith.constant dense<0.000000e+00> : vector<1x4xf32>
    %1 = vector.multi_reduction <add>, %0, %cst [2] : vector<1x4x256xf32> to vector<1x4xf32>
    %2 = vector.shape_cast %1 : vector<1x4xf32> to vector<1x4x1xf32>
    %cst_2 = arith.constant 2.560000e+02 : f32
    %3 = vector.broadcast %cst_2 : f32 to vector<1x4x1xf32>
    %4 = arith.divf %2, %3 : vector<1x4x1xf32>
    %5 = vector.broadcast %4 : vector<1x4x1xf32> to vector<1x4x256xf32>
    %6 = arith.subf %0, %5 : vector<1x4x256xf32>
    %7 = arith.mulf %6, %6 : vector<1x4x256xf32>
    %cst_3 = arith.constant dense<0.000000e+00> : vector<1x4xf32>
    %8 = vector.multi_reduction <add>, %7, %cst_3 [2] : vector<1x4x256xf32> to vector<1x4xf32>
    %9 = vector.shape_cast %8 : vector<1x4xf32> to vector<1x4x1xf32>
    %cst_4 = arith.constant 0.00392156886 : f32
    %10 = vector.broadcast %cst_4 : f32 to vector<1x4x1xf32>
    %11 = arith.mulf %9, %10 : vector<1x4x1xf32>
    %12 = math.sqrt %11 : vector<1x4x1xf32>
    %cst_5 = arith.constant 9.99999974E-6 : f32
    %13 = vector.broadcast %cst_5 : f32 to vector<1x4x1xf32>
    %14 = arith.addf %12, %13 : vector<1x4x1xf32>
    %cst_6 = arith.constant 1.000000e+00 : f32
    %15 = vector.broadcast %cst_6 : f32 to vector<1x4x1xf32>
    %16 = arith.divf %15, %14 : vector<1x4x1xf32>
    %c0_7 = arith.constant 0 : index
    %c0_8 = arith.constant 0 : index
    %c0_9 = arith.constant 0 : index
    %17 = vector.load %arg2[%c0_7, %c0_8, %c0_9] : memref<1x4x1xf32, #tpu.memory_space<vmem>>, vector<1x4x1xf32>
    %18 = arith.mulf %17, %16 : vector<1x4x1xf32>
    %c0_10 = arith.constant 0 : index
    %c0_11 = arith.constant 0 : index
    %c0_12 = arith.constant 0 : index
    %19 = vector.load %arg3[%c0_10, %c0_11, %c0_12] : memref<1x4x1xf32, #tpu.memory_space<vmem>>, vector<1x4x1xf32>
    %20 = arith.mulf %4, %18 : vector<1x4x1xf32>
    %21 = arith.subf %19, %20 : vector<1x4x1xf32>
    %22 = vector.broadcast %18 : vector<1x4x1xf32> to vector<1x4x256xf32>
    %23 = arith.mulf %0, %22 : vector<1x4x256xf32>
    %24 = vector.broadcast %21 : vector<1x4x1xf32> to vector<1x4x256xf32>
    %25 = arith.addf %23, %24 : vector<1x4x256xf32>
    %c0_13 = arith.constant 0 : index
    %c0_14 = arith.constant 0 : index
    %c0_15 = arith.constant 0 : index
    %26 = vector.load %arg4[%c0_13, %c0_14, %c0_15] : memref<1x4x256xf32, #tpu.memory_space<vmem>>, vector<1x4x256xf32>
    tpu.vector_store %arg4[%c0_13, %c0_14, %c0_15], %25 {strides = array<i32>} : memref<1x4x256xf32, #tpu.memory_space<vmem>>, vector<1x4x256xf32>,
    return
  }
  func.func @transform_0(%arg0: i32) -> (i32, i32, i32) {
    %c0_i32 = arith.constant 0 : i32
    %c0_i32_0 = arith.constant 0 : i32
    %c0_i32_1 = arith.constant 0 : i32
    return %arg0, %c0_i32, %c0_i32_0 : i32, i32, i32
  }
  func.func @transform_1(%arg0: i32) -> (i32, i32, i32) {
    %c0_i32 = arith.constant 0 : i32
    %c0_i32_0 = arith.constant 0 : i32
    %c0_i32_1 = arith.constant 0 : i32
    %c0_i32_2 = arith.constant 0 : i32
    return %c0_i32, %c0_i32_0, %c0_i32_1 : i32, i32, i32
  }
  func.func @transform_2(%arg0: i32) -> (i32, i32, i32) {
    %c0_i32 = arith.constant 0 : i32
    %c0_i32_0 = arith.constant 0 : i32
    %c0_i32_1 = arith.constant 0 : i32
    %c0_i32_2 = arith.constant 0 : i32
    return %c0_i32, %c0_i32_0, %c0_i32_1 : i32, i32, i32
  }
  func.func @transform_3(%arg0: i32) -> (i32, i32, i32) {
    %c0_i32 = arith.constant 0 : i32
    %c0_i32_0 = arith.constant 0 : i32
    %c0_i32_1 = arith.constant 0 : i32
    return %arg0, %c0_i32, %c0_i32_0 : i32, i32, i32
  }
}

</mosaic_0001>

<bundles_post_ra>
// kernel: tpu_custom_call.1
= control target key start
LH: loop header
LB: loop body
LE: loop exit
PB: predicated region body
PF: predicated region fallthrough
CT: control target
= control target key end

     0   :  { %8 = vsyncpa [#allocation3], 0  ;;  %s716_s0 = inlined_call_operand.hbm [shape: f32[2,4,256], index: 0, kind: input, shape index: {}]   ;;  %s717_s1 = inlined_call_operand.vmem [shape: f32[1,4,1], index: 1, kind: input, shape index: {}]   ;;  %s718_s2 = inlined_call_operand.vmem [shape: f32[1,4,1], index: 2, kind: input, shape index: {}]   ;;  %s719_s3 = inlined_call_operand.hbm [shape: f32[2,4,256], index: 3, kind: output, shape index: {}]  }
   0x1   :  { %10 = vsyncpa [#allocation3 + $0x1], 0 }
   0x2   :  { %11 = vsyncpa [#allocation4], 0 }
   0x3   :  { %13 = vsyncpa [#allocation4 + $0x1], 0  ;;  %s565_s12 = smov 0   ;;  %s567_s13 = smov 0  }
   0x4   :  { %s569_s14 = smov 0   ;;  %s571_s15 = smov 0  }
   0x5 LB: > { %s586_s16 = sadd.s32 4294967295, %s540_s15   ;;  %s371_s17 = sadd.s32 4294967294, %s540_s15   ;;  %s540_s15 = sphi %s571_s15, %s729_s15   ;;  %s536_s14 = sphi %s569_s14, %s728_s14   ;;  %s532_s13 = sphi %s567_s13, %s727_s13   ;;  %s528_s12 = sphi %s565_s12, %s726_s12  }
   0x6   : > { %s590_s18 = sadd.s32 1, %s540_s15   ;;  %s26_s19 = sadd.s32 1, %s536_s14 }
   0x7   : > { %s23_s20 = ssub.s32 %s540_s15, %s590_s18  ;;  %p33_p0 = scmp.ne.s32.totalorder %s536_s14, %s532_s13 }
   0x8   : > { %p24_p1 = scmp.eq.s32.totalorder %s23_s20, 0  ;;  %p34_p2 = scmp.eq.s32.totalorder %s540_s15, 0 }
   0x9   : > { %p39_p3 = scmp.ne.s32.totalorder %s532_s13, %s528_s12  ;;  %p40_p4 = scmp.eq.s32.totalorder %s586_s16, 0 }
   0xa   : > { %s602_s21 = scalar_select %p24_p1, %s536_s14, %s26_s19  }
   0xb   : > { %p604_p5 = por %p34_p2, %p33_p0  ;;  %p608_p6 = por %p40_p4, %p39_p3 }
   0xc   : > { %p105_p7 = scmp.eq.s32.totalorder %s586_s16, 1  ;;  %p111_p8 = scmp.eq.s32.totalorder %s371_s17, 1 }
   0xd   : > { %p399_p10 = scmp.lt.s32.totalorder %s540_s15, 2  ;;  %s137_s26 = sand.u32 1, %s536_s14  }
   0xe   : > { %p615_p11 = por %p105_p7, %p33_p0  ;;  %p619_p12 = por %p111_p8, %p39_p3 }
   0xf   : > { %s385_s27 = sshll.u32 %s540_s15, 3  ;;  %s374_s28 = sshll.u32 %s137_s26, 3 }
  0x10   : > { %s146_s4 = scalar_lea.hbm %s716_s0, %s385_s27  ;;  %s141_s6 = scalar_lea.vmem [#allocation2], %s374_s28 }
  0x11   : > { %s148_s5 = sshll.u32 %s146_s4, 4  ;;  %s150_s7 = sshll.u32 %s141_s6, 4  ;;  %s149_s5 = int_to_ptr.hbm [resolvable:$true] %s148_s5  ;;  %s151_s7 = int_to_ptr.vmem [resolvable:$true] %s150_s7 }
  0x12   : > { %p630_p13 = pnand %p399_p10, %p604_p5  ;;  %p377_p0 = scmp.ge.s32.totalorder %s540_s15, 1 }
  0x13   : > { %p155_p1 = scmp.lt.s32.totalorder %s540_s15, 3  ;;  %s138_s9 = scalar_lea.sflag [#allocation3], %s137_s26 }
  0x14   : > { %s444_s10 = sshra.s32 %s149_s5, 4  ;;  %p448_p3 = pneg %p630_p13  ;;  %s445_s10 = int_to_ptr.hbm [resolvable:$true] %s444_s10 }
  0x15   : > { %s446_s11 = scalar_lea.hbm %s445_s10, 8  ;;  %s451_s20 = scalar_lea.hbm %s716_s0, 16 }
  0x16   : > { %p447_p2 = scmp.ne.s32.totalorder %s445_s10, %s446_s11  ;;  %p452_p5 = scmp.lt.s32.totalorder %s445_s10, %s716_s0 }
  0x17   : > { %p453_p8 = scmp.lt.s32.totalorder %s451_s20, %s446_s11 }
  0x18   : > { %p449_p4 = pnand %p448_p3, %p447_p2 }
  0x19   : > { %p454_p10 = por %p453_p8, %p452_p5 }
  0x1a   : > { %p450_p7 = pneg %p449_p4 }
  0x1c   : > { %p455_p9 = pnand %p454_p10, %p450_p7 }
  0x1e   : > { %458 = shalt.err (!%p455_p9)
}
  0x1f   : > { %394 = dma.hbm_to_vmem [thread:$0]  (!%p630_p13), %s149_s5, 128, %s151_s7, %s138_s9  }
  0x20   : > { %p156_p2 = pnand %p377_p0, %p155_p1 }
  0x21   : > { %s651_s26 = sand.u32 (!%p156_p2), 1, %s532_s13  }
  0x22   : > { %159 = sbr.rel (%p156_p2) target bundleno = 477 (0x1dd), region = 32  ;;  %s378_s28 = sshll.u32 (!%p156_p2), %s651_s26, 3 }
  0x23   : > { %s162_s29 = scalar_lea.sflag (!%p156_p2), [#allocation3], %s651_s26  ;;  %s165_s30 = scalar_lea.vmem (!%p156_p2), [#allocation2], %s378_s28 }
  0x27   : > { %519 = dma.done.wait (%p608_p6), %s162_s29, 128  }
  0x28   : > { %521 = vsyncadd (%p608_p6), %s162_s29, 4294967168  ;;  %v661_v0 = vld [vmem:[%s165_s30] sm:$0xff]  ;;  %vm196_vm0 = vcmask 1043456   ;;  %v542_v6 = vmov 256.0   ;;  %v543_v12 = vmov 839922192  }
  0x29   : > { %191 = vst [vmem:[#allocation1] ss:$2 sm:$0xff] %v661_v0  ;;  %438 = vrcp.f32 %v542_v6  ;;  %v212_v13 = vunpack.c.l.s4 %v543_v12  ;;  %v544_v26 = vmov 0   ;;  %v258_v48 = vld [vmem:[%s717_s1] sm:$0xf]  ;;  %s386_s7 = sshll.u32 %s586_s16, 3 }
  0x2a   : > { %436 = vset.pattern.permute.xlu1 %v544_v26  ;;  %437 = vset.pattern.permute.xlu0 %v544_v26  ;;  %v260_v53 = vld [vmem:[%s718_s2] sm:$0xf]  ;;  %s296_s10 = scalar_lea.hbm %s719_s3, %s386_s7  ;;  %s188_s11 = scalar_lea.vmem [#allocation5], %s378_s28 }
  0x2b   : > { %v666_v15 = vunpack.c.0.s8 %v212_v13  ;;  %s298_s17 = sshll.u32 %s188_s11, 4  ;;  %s300_s19 = sshll.u32 %s296_s10, 4  ;;  %s299_s17 = int_to_ptr.vmem [resolvable:$true] %s298_s17  ;;  %s301_s19 = int_to_ptr.hbm [resolvable:$true] %s300_s19 }
  0x2c   : > { %s285_s16 = scalar_lea.sflag [#allocation4], %s651_s26  ;;  %s488_s20 = sshra.s32 %s301_s19, 4  ;;  %s489_s20 = int_to_ptr.hbm [resolvable:$true] %s488_s20 }
  0x2d   : > { %s490_s22 = scalar_lea.hbm %s489_s20, 8  ;;  %s494_s29 = scalar_lea.hbm %s719_s3, 16 }
  0x2e   : > { %p491_p6 = scmp.ne.s32.totalorder %s489_s20, %s490_s22  ;;  %p495_p0 = scmp.lt.s32.totalorder %s489_s20, %s719_s3 }
  0x2f   : > { %v439_v7 = vpop.eup %438  ;;  %p496_p1 = scmp.lt.s32.totalorder %s494_s29, %s490_s22 }
  0x30   : > { %v192_v1 = vld.sshfl [vmem:[#allocation1] sm:$0xff pattern:$0x75316420]  ;;  %v193_v2 = vld.sshfl [vmem:[#allocation1 + $0x8] sm:$0xff pattern:$0x75316420]  ;;  %vm207_vm1 = vweird.f32 %v439_v7  ;;  %p492_p9 = pnand %p491_p6, %p615_p11 }
  0x31   : > { %v197_v3 = vsel %vm196_vm0, %v192_v1, 0.0  ;;  %v198_v4 = vsel %vm196_vm0, %v193_v2, 0.0  ;;  %v203_v8 = vmul.f32 256.0, %v439_v7  ;;  %p497_p3 = por %p496_p1, %p495_p0 }
  0x32   : > { %v199_v5 = vadd.f32 %v198_v4, %v197_v3  ;;  %p493_p13 = pneg %p492_p9 }
  0x33   : > { %v204_v9 = vsub.f32 1.0, %v203_v8 }
  0x34   : > { %200 = vadd.xlane.f32.xlu0 %v199_v5  ;;  %p498_p4 = pnand %p497_p3, %p493_p13 }
  0x35   : > { %v205_v10 = vmul.f32 %v439_v7, %v204_v9 }
  0x37   : > { %v206_v11 = vadd.f32 %v439_v7, %v205_v10 }
  0x39   : > { %v208_v14 = vsel %vm207_vm1, %v439_v7, %v206_v11 }
  0xa7   : > { %v201_v16 = vpop.xlane.xlu0 %200 }
  0xa8   : > { %v209_v17 = vmul.f32 %v208_v14, %v201_v16 }
  0xaa   : > { %v214_v18 = vperm.slane %v209_v17, %v666_v15 }
  0xac   : > { %v216_v19 = vsub.f32 %v661_v0, %v214_v18 }
  0xae   : > { %v217_v20 = vmul.f32 %v216_v19, %v216_v19 }
  0xb0   : > { %219 = vst [vmem:[#allocation1] ss:$2 sm:$0xff] %v217_v20 }
  0xb7   : > { %v220_v21 = vld.sshfl [vmem:[#allocation1] sm:$0xff pattern:$0x75316420]  ;;  %v221_v22 = vld.sshfl [vmem:[#allocation1 + $0x8] sm:$0xff pattern:$0x75316420] }
  0xb8   : > { %v224_v23 = vsel %vm196_vm0, %v220_v21, 0.0  ;;  %v225_v24 = vsel %vm196_vm0, %v221_v22, 0.0 }
  0xb9   : > { %v226_v25 = vadd.f32 %v225_v24, %v224_v23 }
  0xbb   : > { %227 = vadd.xlane.f32.xlu0 %v226_v25 }
 0x12e   : > { %v228_v27 = vpop.xlane.xlu0 %227 }
 0x12f   : > { %v229_v28 = vmul.f32 0.003921569, %v228_v27 }
 0x131   : > { %440 = vrsqrt.f32 %v229_v28  ;;  %vm237_vm2 = vcmp.eq.f32.partialorder %v229_v28, inf  ;;  %v240_v36 = vand.u32 2147483648, %v229_v28  ;;  %vm239_vm3 = vcmp.eq.f32.partialorder %v229_v28, 0.0 }
 0x137   : > { %v441_v29 = vpop.eup %440 }
 0x138   : > { %v231_v30 = vmul.f32 %v441_v29, %v229_v28 }
 0x13a   : > { %v232_v31 = vmul.f32 %v441_v29, %v231_v30 }
 0x13c   : > { %v233_v32 = vmul.f32 0.5, %v232_v31 }
 0x13e   : > { %v234_v33 = vsub.f32 1.5, %v233_v32 }
 0x140   : > { %v235_v34 = vmul.f32 %v441_v29, %v234_v33 }
 0x142   : > { %v236_v35 = vmul.f32 %v235_v34, %v229_v28 }
 0x144   : > { %v238_v37 = vsel %vm237_vm2, %v229_v28, %v236_v35 }
 0x145   : > { %v241_v38 = vsel %vm239_vm3, %v240_v36, %v238_v37 }
 0x146   : > { %v242_v39 = vadd.f32 1e-05, %v241_v38 }
 0x148   : > { %442 = vrcp.f32 %v242_v39  ;;  %v254_v43 = vand.u32 2147483648, %v242_v39  ;;  %v252_v45 = vand.u32 2147483647, %v242_v39  ;;  %vm248_vm5 = vweird.f32 %v242_v39 }
 0x14a   : > { %v255_v47 = vor.u32 1.1754944e-38, %v254_v43  ;;  %vm253_vm7 = vcmp.eq.f32.partialorder %v252_v45, 8.507059e+37 }
 0x14e   : > { %v443_v40 = vpop.eup %442 }
 0x14f   : > { %v244_v41 = vmul.f32 %v443_v40, %v242_v39  ;;  %vm249_vm4 = vweird.f32 %v443_v40 }
 0x150   : > { %vm250_vm6 = vmor %vm248_vm5, %vm249_vm4 }
 0x151   : > { %v245_v42 = vsub.f32 1.0, %v244_v41 }
 0x153   : > { %v246_v44 = vmul.f32 %v443_v40, %v245_v42 }
 0x155   : > { %v247_v46 = vadd.f32 %v443_v40, %v246_v44 }
 0x157   : > { %v251_v49 = vsel %vm250_vm6, %v443_v40, %v247_v46 }
 0x158   : > { %v256_v50 = vsel %vm253_vm7, %v255_v47, %v251_v49 }
 0x159   : > { %v259_v51 = vmul.f32 %v258_v48, %v256_v50 }
 0x15b   : > { %265 = vperm.xlu1 %436, %v259_v51   ;;  %v261_v52 = vmul.f32 %v259_v51, %v209_v17 }
 0x15d   : > { %v262_v54 = vsub.f32 %v260_v53, %v261_v52 }
 0x163   : > { %275 = vperm.xlu1 %436, %v262_v54  }
 0x1cd   : > { %v266_v55 = vpop.permute.xlu1 %265 }
 0x1ce   : > { %v270_v56 = vperm.slane %v266_v55, %v666_v15 }
 0x1d0   : > { %v272_v58 = vmul.f32 %v270_v56, %v661_v0 }
 0x1d5   : > { %v276_v57 = vpop.permute.xlu1 %275 }
 0x1d6   : > { %v280_v59 = vperm.slane %v276_v57, %v666_v15 }
 0x1d8   : > { %v282_v60 = vadd.f32 %v280_v59, %v272_v58 }
 0x1da   : > { %283 = vst [vmem:[%s188_s11] sm:$0xff] %v282_v60 }
 0x1db   : > { %501 = shalt.err (!%p498_p4)
}
 0x1dc   : > { %389 = dma.vmem_to_hbm [thread:$0]  (%p615_p11), %s299_s17, 128, %s301_s19, %s285_s16  }
 0x1dd PF: > { %s312_s26 = sand.u32 1, %s528_s12   ;;  %p725_p7 = scmp.ge.s32.totalorder %s540_s15, 2 }
 0x1de   : > { %s313_s4 = scalar_lea.sflag [#allocation4], %s312_s26 }
 0x1df   : > { %p396_p5 = pnand %p725_p7, %p619_p12 }
 0x1e1   : > { %p397_p8 = pneg %p396_p5 }
 0x1e3   : > { %523 = dma.done.wait (%p397_p8), %s313_s4, 128  }
 0x1e4   : > { %525 = vsyncadd (%p397_p8), %s313_s4, 4294967168  ;;  %p16_p10 = scmp.ge.s32.totalorder %s590_s18, 4   ;;  %s726_s12 = smov %s532_s13 }
 0x1e5   : > { %s727_s13 = smov %s536_s14  ;;  %s728_s14 = smov %s602_s21 }
 0x1e6   : > { %s729_s15 = smov %s590_s18  ;;  %18 = sbr.rel (!%p16_p10) target bundleno = 5 (0x5), region = 77 }
 0x1eb   :  { %319 = vsyncpa [#allocation3], 1 }
 0x1ec   :  { %321 = vsyncpa [#allocation3 + $0x1], 1 }
 0x1ed   :  { %322 = vsyncpa [#allocation4], 1 }
 0x1ee   :  { %324 = vsyncpa [#allocation4 + $0x1], 1 }

</bundles_post_ra>
